<compile_context>
chip_gen: v5e
topology: v5e:2x2
jax: 0.10.0
libtpu: 0.0.40
codegen_flags: <defaults>
</compile_context>

<pallas_src>
import functools

import jax
import jax.numpy as jnp
import numpy as np
from jax.experimental import pallas as pl
from jax.experimental.pallas import tpu as pltpu

KERNEL_SIZE = 7
PAD = 3  # padding = 3 for kernel_size = 7 (as in the PyTorch module)


# --------------------------------------------------------------------------- helpers
def _round_up(x, m):
    return (x + m - 1) // m * m


def _sublane_pack(dtype):
    # sublane packing factor: 8 for f32, 16 for bf16, 32 for int8/fp8
    return max(8, 32 // jnp.dtype(dtype).itemsize)


def _default_vmem_limit():
    """Generation-aware scoped-VMEM limit (passed via vmem_limit_bytes):
    ~3/8 of physical VMEM capped at 48 MiB -> ~24 MiB on v7x (64 MiB VMEM),
    ~48 MiB on v5e / v6e (128 MiB VMEM)."""
    try:
        phys = int(pltpu.get_tpu_info().vmem_capacity_bytes)
    except Exception:  # no TPU visible / older jax: assume the smallest (v7x)
        phys = 64 * 1024 * 1024
    return int(min(max(phys * 3 // 8, 16 * 1024 * 1024), 48 * 1024 * 1024))


def _pick_block_b(B, pack, max_bb=64):
    """Largest batch tile: a multiple of `pack` (full B when B <= pack), capped so
    the parallel batch axis keeps >= 2 grid steps when B allows (v7x megacore),
    preferring tiles that divide B (avoids a wrapper-side pad of the input)."""
    if B <= pack:
        return B
    cap = min(max_bb, B // 2 if B >= 2 * pack else B)
    cap = max(cap - cap % pack, pack)
    for bb in range(cap, pack - 1, -pack):
        if B % bb == 0:
            return bb
    return pack


def _bb_candidates(bb_pref, pack):
    cands = [bb_pref]
    b = (bb_pref - 1) // pack * pack
    while b >= pack:
        if b != bb_pref:
            cands.append(b)
        b -= pack
    return cands


def _block_c_candidates(C, pack, max_slabs=32):
    """Channel-tile candidates, largest first: sublane-aligned divisors of C (so
    no channels are ever silently dropped), capped at max_slabs*pack channels per
    block; plus full C when it is small or when no aligned divisor exists."""
    max_bc = max_slabs * pack
    cands = set()
    if C <= max_bc or C % pack != 0:
        cands.add(C)
    top = min((C // pack) * pack, max_bc)
    for d in range(top, pack - 1, -pack):
        if C % d == 0:
            cands.add(d)
    return sorted(cands, reverse=True) if cands else [C]


def _fused_live_bytes(bb, bc, L, l_pad, in_isz, out_isz, chunk):
    in_b = 2 * bb * bc * L * in_isz        # double-buffered input block
    out_b = 2 * bb * l_pad * out_isz       # double-buffered output block
    scr_b = 2 * bb * l_pad * 4             # two f32 accumulator rows
    epi_b = 4 * bb * l_pad * 4             # epilogue temporaries (rolled rows / acc)
    tmp_b = bb * chunk * L * 4             # one upcast channel slab
    return in_b + out_b + scr_b + epi_b + tmp_b + (1 << 20)


def _split_live_bytes_a(bb, bc, bl, in_isz, chunk):
    in_b = 2 * bb * bc * bl * in_isz       # double-buffered input block
    out_b = 2 * 2 * bb * bl * 4            # two double-buffered f32 outputs
    tmp_b = bb * chunk * bl * 4            # one upcast channel slab
    return in_b + out_b + tmp_b + (1 << 20)


def _split_live_bytes_b(bb, w_p, out_isz):
    in_b = 2 * 2 * bb * w_p * 4            # sum / max rows, double-buffered
    out_b = 2 * bb * w_p * out_isz         # double-buffered output block
    epi_b = 6 * bb * w_p * 4               # rolled rows / masks / acc
    return in_b + out_b + epi_b + (1 << 20)


# --------------------------------------------------------------------------- kernels
def _partial_sum_max(x_ref, chunk):
    """f32 channel-sum and channel-max of a (Bt, Ct, Lt) VMEM block, reduced in
    `chunk`-channel slabs so only one slab is upcast to f32 at a time."""
    n = x_ref.shape[1] // chunk

    def slab(i):
        xc = x_ref[:, i * chunk:(i + 1) * chunk, :].astype(jnp.float32)
        return jnp.sum(xc, axis=1), jnp.max(xc, axis=1)

    s, m = slab(0)
    for i in range(1, n):                  # static unroll (n <= 32 by construction)
        ps, pm = slab(i)
        s = s + ps
        m = jnp.maximum(m, pm)
    return s, m


def _fused_kernel(x_ref, w_ref, o_ref, sum_ref, max_ref, *, l, l_pad, chunk):
    """Single-pass kernel: grid = (batch tiles [parallel], channel tiles [arbitrary]).

    x_ref   : (Bt, Ct, L)   input block (VMEM)
    w_ref   : (2, K)        conv taps (SMEM); row 0 already scaled by 1/C
    o_ref   : (Bt, Lp)      lane-dense output block, written on the last C step
    sum_ref : (Bt, Lp) f32  running channel sum  (lane tail kept at zero)
    max_ref : (Bt, Lp) f32  running channel max  (lane tail kept at zero)
    """
    c_idx = pl.program_id(1)
    ps, pm = _partial_sum_max(x_ref, chunk)          # (Bt, L) f32

    @pl.when(c_idx == 0)
    def _init():
        # Zero the lane tail once: the cyclic rolls below then reproduce Conv1d's
        # zero padding exactly (l_pad - l >= PAD guarantees >= 3 zero lanes).
        tail = jnp.zeros((ps.shape[0], l_pad - l), jnp.float32)
        sum_ref[:, l:] = tail
        max_ref[:, l:] = tail
        sum_ref[:, :l] = ps
        max_ref[:, :l] = pm

    @pl.when(c_idx > 0)
    def _accumulate():
        sum_ref[:, :l] = sum_ref[:, :l] + ps
        max_ref[:, :l] = jnp.maximum(max_ref[:, :l], pm)

    @pl.when(c_idx == pl.num_programs(1) - 1)
    def _finalize():
        avg_p = sum_ref[...]                         # 1/C already folded into w[0, :]
        max_p = max_ref[...]
        acc = jnp.zeros_like(avg_p)
        for k in range(KERNEL_SIZE):                 # static unroll; shifts ride the XLU
            s = (PAD - k) % l_pad
            a_k = pltpu.roll(avg_p, shift=s, axis=1) if s else avg_p
            m_k = pltpu.roll(max_p, shift=s, axis=1) if s else max_p
            acc = acc + w_ref[0, k] * a_k + w_ref[1, k] * m_k
        o_ref[...] = jax.nn.sigmoid(acc).astype(o_ref.dtype)


def _reduce_kernel(x_ref, sum_ref, max_ref, *, chunk):
    """Split path stage 1: grid = (batch, L tiles, channel tiles [arbitrary]).
    The (Bt, Lt) f32 outputs act as accumulators across the channel axis."""
    c_idx = pl.program_id(2)
    ps, pm = _partial_sum_max(x_ref, chunk)

    @pl.when(c_idx == 0)
    def _init():
        sum_ref[...] = ps
        max_ref[...] = pm

    @pl.when(c_idx > 0)
    def _accumulate():
        sum_ref[...] = sum_ref[...] + ps
        max_ref[...] = jnp.maximum(max_ref[...], pm)


def _conv_sigmoid_kernel(w_ref, sum_ref, max_ref, o_ref, *, l):
    """Split path stage 2: 7-tap conv + sigmoid on the reduced (Bt, Wp) rows.
    Per-tap masks implement Conv1d's zero padding and also discard lanes >= l
    (which may hold unspecified data from partial L blocks in stage 1)."""
    w_p = o_ref.shape[-1]
    avg = sum_ref[...]                               # 1/C already folded into w[0, :]
    mx = max_ref[...]
    lane = jax.lax.broadcasted_iota(jnp.int32, avg.shape, 1)
    acc = jnp.zeros(avg.shape, jnp.float32)
    for k in range(KERNEL_SIZE):
        s = PAD - k                                  # output j reads input j - s
        sm = s % w_p
        a_k = pltpu.roll(avg, shift=sm, axis=1) if sm else avg
        m_k = pltpu.roll(mx, shift=sm, axis=1) if sm else mx
        tap = w_ref[0, k] * a_k + w_ref[1, k] * m_k
        valid = jnp.logical_and(lane >= s, lane < l + s)   # 0 <= j - s < l
        acc = acc + jnp.where(valid, tap, 0.0)
    o_ref[...] = jax.nn.sigmoid(acc).astype(o_ref.dtype)


# --------------------------------------------------------------------------- wrapper
def spatial_attention(x, w, *, block_b=None, block_c=None,
                      vmem_limit_bytes=None, force_split=False):
    """SpatialAttention forward. x: (B, C, L); w: (2, K) = Conv1d(2,1,K,bias=False)
    weight with the out-channel dim squeezed. Returns (B, 1, L) like the module."""
    B, C, L = x.shape
    assert w.shape == (2, KERNEL_SIZE)

    if block_c is not None and C % block_c != 0:
        raise ValueError("block_c must evenly divide C (channels would be dropped)")
    if block_b is not None and not (block_b == B or block_b % 8 == 0):
        raise ValueError("block_b must be a multiple of 8 or equal to B")

    out_dtype = x.dtype
    in_isz = jnp.dtype(x.dtype).itemsize
    out_isz = in_isz
    pack = _sublane_pack(x.dtype)

    # Fold the 1/C mean scale into the avg-channel taps: removes a full-row VPU
    # multiply from the kernel epilogue for the price of 7 scalar multiplies.
    w_scaled = w.astype(jnp.float32).at[0, :].multiply(1.0 / C)

    limit = int(vmem_limit_bytes) if vmem_limit_bytes is not None else _default_vmem_limit()
    budget = int(limit * 0.85)                       # headroom for compiler temporaries

    l_pad = _round_up(L + PAD, 128)                  # lane-dense conv / output width

    bb_list = [block_b] if block_b is not None else \
        _bb_candidates(_pick_block_b(B, pack), pack)
    bc_list = [block_c] if block_c is not None else _block_c_candidates(C, pack)

    # ----------------------------------------------------------------- fused path
    chosen = None
    if not force_split:
        for bb in bb_list:
            for bc in bc_list:
                chunk = pack if bc % pack == 0 else bc
                fits = _fused_live_bytes(bb, bc, L, l_pad, in_isz, out_isz, chunk) <= budget
                if fits or (block_b is not None and block_c is not None):
                    chosen = (bb, bc, chunk)
                    break
            if chosen is not None:
                break

    if chosen is not None:
        bb, bc, chunk = chosen
        Bp = _round_up(B, bb)
        xp = x if Bp == B else jnp.pad(x, ((0, Bp - B), (0, 0), (0, 0)))
        grid = (Bp // bb, C // bc)
        live = _fused_live_bytes(bb, bc, L, l_pad, in_isz, out_isz, chunk)
        out = pl.pallas_call(
            functools.partial(_fused_kernel, l=L, l_pad=l_pad, chunk=chunk),
            out_shape=jax.ShapeDtypeStruct((Bp, l_pad), out_dtype),
            grid=grid,
            in_specs=[
                pl.BlockSpec((bb, bc, L), lambda b, c: (b, c, 0)),
                pl.BlockSpec((2, KERNEL_SIZE), lambda b, c: (0, 0),
                             memory_space=pltpu.MemorySpace.SMEM),
            ],
            out_specs=pl.BlockSpec((bb, l_pad), lambda b, c: (b, 0)),
            scratch_shapes=[
                pltpu.VMEM((bb, l_pad), jnp.float32),   # running channel sum
                pltpu.VMEM((bb, l_pad), jnp.float32),   # running channel max
            ],
            compiler_params=pltpu.CompilerParams(
                dimension_semantics=("parallel", "arbitrary"),
                vmem_limit_bytes=int(max(limit, live + (2 << 20)))),
            cost_estimate=pl.CostEstimate(
                flops=int(2 * B * C * L + (4 * KERNEL_SIZE + 4) * B * L),
                transcendentals=int(B * l_pad),
                bytes_accessed=int(Bp * C * L * in_isz + Bp * l_pad * out_isz + 64)),
        )(xp, w_scaled)
        return out[:B, :L].reshape(B, 1, L)

    # -------------------------------------------- split path (large L / tiny budget)
    # Stage 1: tiled channel reduction -> f32 (B, Wp) sum and max rows.
    if L <= 128:
        bl_cands = [_round_up(L, 128)]
    else:
        cap = _round_up(L, 128)
        bl_cands = sorted({min(cap, c) for c in (4096, 2048, 1024, 512, 256, 128)},
                          reverse=True)
    pick = None
    for bl in bl_cands:
        for bb in bb_list:
            for bc in bc_list:
                chunk = pack if bc % pack == 0 else bc
                if _split_live_bytes_a(bb, bc, bl, in_isz, chunk) <= budget:
                    pick = (bb, bc, bl, chunk)
                    break
            if pick is not None:
                break
        if pick is not None:
            break
    if pick is None:                                 # smallest tiles; bump the limit
        bl, bb, bc = bl_cands[-1], bb_list[-1], bc_list[-1]
        chunk = pack if bc % pack == 0 else bc
        pick = (bb, bc, bl, chunk)
    bb, bc, bl, chunk = pick

    Bp = _round_up(B, bb)
    xp = x if Bp == B else jnp.pad(x, ((0, Bp - B), (0, 0), (0, 0)))
    nl = pl.cdiv(L, bl)
    w_p = nl * bl                                    # 128-multiple working width
    live_a = _split_live_bytes_a(bb, bc, bl, in_isz, chunk)
    sum_rows, max_rows = pl.pallas_call(
        functools.partial(_reduce_kernel, chunk=chunk),
        out_shape=(jax.ShapeDtypeStruct((Bp, w_p), jnp.float32),
                   jax.ShapeDtypeStruct((Bp, w_p), jnp.float32)),
        grid=(Bp // bb, nl, C // bc),
        in_specs=[pl.BlockSpec((bb, bc, bl), lambda b, li, c: (b, c, li))],
        out_specs=(pl.BlockSpec((bb, bl), lambda b, li, c: (b, li)),
                   pl.BlockSpec((bb, bl), lambda b, li, c: (b, li))),
        compiler_params=pltpu.CompilerParams(
            dimension_semantics=("parallel", "parallel", "arbitrary"),
            vmem_limit_bytes=int(max(limit, live_a + (2 << 20)))),
        cost_estimate=pl.CostEstimate(
            flops=int(2 * B * C * L), transcendentals=0,
            bytes_accessed=int(Bp * C * L * in_isz + 2 * Bp * w_p * 4)),
    )(xp)

    # Stage 2: 7-tap conv + sigmoid over the small reduced rows (full L per block).
    # TODO(synk): halo-tile the L axis of this stage too for extremely long sequences.
    bb2 = None
    for cand in _bb_candidates(_pick_block_b(Bp, 8), 8):
        if Bp % cand == 0 and _split_live_bytes_b(cand, w_p, out_isz) <= budget:
            bb2 = cand
            break
    if bb2 is None:
        bb2 = 8 if Bp % 8 == 0 else Bp
    live_b = _split_live_bytes_b(bb2, w_p, out_isz)
    out = pl.pallas_call(
        functools.partial(_conv_sigmoid_kernel, l=L),
        out_shape=jax.ShapeDtypeStruct((Bp, w_p), out_dtype),
        grid=(Bp // bb2,),
        in_specs=[
            pl.BlockSpec((2, KERNEL_SIZE), lambda b: (0, 0),
                         memory_space=pltpu.MemorySpace.SMEM),
            pl.BlockSpec((bb2, w_p), lambda b: (b, 0)),
            pl.BlockSpec((bb2, w_p), lambda b: (b, 0)),
        ],
        out_specs=pl.BlockSpec((bb2, w_p), lambda b: (b, 0)),
        compiler_params=pltpu.CompilerParams(
            dimension_semantics=("parallel",),
            vmem_limit_bytes=int(max(limit, live_b + (2 << 20)))),
    )(w_scaled, sum_rows, max_rows)
    return out[:B, :L].reshape(B, 1, L)


# --------------------------------------------------------------------------- reference
def reference(x, w):
    """Pure-JAX reference mirroring the PyTorch forward (unscaled weights)."""
    avg = jnp.mean(x, axis=1, keepdims=True)
    mx = jnp.max(x, axis=1, keepdims=True)
    cat = jnp.concatenate([avg, mx], axis=1)                  # (B, 2, L)
    out = jax.lax.conv_general_dilated(
        cat, w.reshape(1, 2, KERNEL_SIZE),
        window_strides=(1,), padding=[(PAD, PAD)],
        dimension_numbers=("NCH", "OIH", "NCH"))
    return jax.nn.sigmoid(out)


if __name__ == "__main__":
    key = jax.random.PRNGKey(0)
    k1, k2, k3, k4, k5, kw = jax.random.split(key, 6)

    # Conv1d(2, 1, 7, bias=False) weight (1, 2, 7) with out-channel squeezed -> (2, 7).
    w = (jax.random.uniform(kw, (2, KERNEL_SIZE), dtype=jnp.float32) - 0.5) * 0.5

    # 1) Small shape matching the module's (B, C, L) convention (fused path).
    x1 = jax.random.normal(k1, (2, 4, 16), dtype=jnp.float32)
    o1 = jax.block_until_ready(spatial_attention(x1, w))
    assert o1.shape == (2, 1, 16)
    np.testing.assert_allclose(np.asarray(o1), np.asarray(reference(x1, w)),
                               atol=1e-5, rtol=1e-5)

    # 2) Batch tiling (>= 2 parallel batch steps) + C-reduction grid axis.
    x2 = jax.random.normal(k2, (16, 32, 48), dtype=jnp.float32)
    o2 = jax.block_until_ready(spatial_attention(x2, w, block_c=8))
    np.testing.assert_allclose(np.asarray(o2), np.asarray(reference(x2, w)),
                               atol=1e-5, rtol=1e-5)

    # 3) Larger C exercising the slab-chunked channel reduction.
    x3 = jax.random.normal(k3, (8, 96, 256), dtype=jnp.float32)
    o3 = jax.block_until_ready(spatial_attention(x3, w))
    np.testing.assert_allclose(np.asarray(o3), np.asarray(reference(x3, w)),
                               atol=1e-4, rtol=1e-4)

    # 4) Two-kernel split path (taken automatically when full L can't fit VMEM).
    x4 = jax.random.normal(k4, (4, 6, 200), dtype=jnp.float32)
    o4 = jax.block_until_ready(spatial_attention(x4, w, force_split=True))
    np.testing.assert_allclose(np.asarray(o4), np.asarray(reference(x4, w)),
                               atol=1e-5, rtol=1e-5)

    # 5) bf16 inputs (f32 accumulation in-kernel, bf16 output cast).
    x5 = jax.random.normal(k5, (4, 24, 40), dtype=jnp.bfloat16)
    o5 = jax.block_until_ready(spatial_attention(x5, w))
    np.testing.assert_allclose(np.asarray(o5.astype(jnp.float32)),
                               np.asarray(reference(x5.astype(jnp.float32), w)),
                               atol=1e-2, rtol=1e-2)

    print("KERNEL_OK")
</pallas_src>

<mosaic_0001>
module attributes {stable_mosaic.version = 11 : i64} {
  func.func @_fused_kernel(%arg0: i32, %arg1: i32, %arg2: memref<2x4x16xf32, #tpu.memory_space<vmem>>, %arg3: memref<2x7xf32, #tpu.memory_space<smem>>, %arg4: memref<2x128xf32, #tpu.memory_space<vmem>>, %arg5: memref<2x128xf32, #tpu.memory_space<vmem>>, %arg6: memref<2x128xf32, #tpu.memory_space<vmem>>) attributes {dimension_semantics = [#tpu.dimension_semantics<parallel>, #tpu.dimension_semantics<arbitrary>], iteration_bounds = array<i64: 1, 1>, scalar_prefetch = 0 : i64, scratch_operands = 2 : i64, tpu.core_type = #tpu.core_type<tc>, window_params = [{transform_indices = @transform_0, window_bounds = array<i64: 2, 4, 16>}, {transform_indices = @transform_1, window_bounds = array<i64: 2, 7>}, {transform_indices = @transform_2, window_bounds = array<i64: 2, 128>}]} {
    %c0 = arith.constant 0 : index
    %c0_0 = arith.constant 0 : index
    %c0_1 = arith.constant 0 : index
    %0 = vector.load %arg2[%c0, %c0_0, %c0_1] : memref<2x4x16xf32, #tpu.memory_space<vmem>>, vector<2x4x16xf32>
    %cst = arith.constant dense<0.000000e+00> : vector<2x16xf32>
    %1 = vector.multi_reduction <add>, %0, %cst [1] : vector<2x4x16xf32> to vector<2x16xf32>
    %cst_2 = arith.constant dense<0xFF800000> : vector<2x16xf32>
    %2 = vector.multi_reduction <maximumf>, %0, %cst_2 [1] : vector<2x4x16xf32> to vector<2x16xf32>
    %c0_i32 = arith.constant 0 : i32
    %3 = arith.cmpi eq, %arg1, %c0_i32 : i32
    %4 = arith.extui %3 : i1 to i32
    %c0_i32_3 = arith.constant 0 : i32
    %5 = arith.cmpi ne, %4, %c0_i32_3 : i32
    scf.if %5 {
      %cst_8 = arith.constant 0.000000e+00 : f32
      %12 = vector.broadcast %cst_8 : f32 to vector<2x112xf32>
      %c0_9 = arith.constant 0 : index
      %c16 = arith.constant 16 : index
      %13 = vector.load %arg5[%c0_9, %c16] : memref<2x128xf32, #tpu.memory_space<vmem>>, vector<2x112xf32>
      tpu.vector_store %arg5[%c0_9, %c16], %12 {strides = array<i32>} : memref<2x128xf32, #tpu.memory_space<vmem>>, vector<2x112xf32>,
      %c0_10 = arith.constant 0 : index
      %c16_11 = arith.constant 16 : index
      %14 = vector.load %arg6[%c0_10, %c16_11] : memref<2x128xf32, #tpu.memory_space<vmem>>, vector<2x112xf32>
      tpu.vector_store %arg6[%c0_10, %c16_11], %12 {strides = array<i32>} : memref<2x128xf32, #tpu.memory_space<vmem>>, vector<2x112xf32>,
      %c0_12 = arith.constant 0 : index
      %c0_13 = arith.constant 0 : index
      %15 = vector.load %arg5[%c0_12, %c0_13] : memref<2x128xf32, #tpu.memory_space<vmem>>, vector<2x16xf32>
      tpu.vector_store %arg5[%c0_12, %c0_13], %1 {strides = array<i32>} : memref<2x128xf32, #tpu.memory_space<vmem>>, vector<2x16xf32>,
      %c0_14 = arith.constant 0 : index
      %c0_15 = arith.constant 0 : index
      %16 = vector.load %arg6[%c0_14, %c0_15] : memref<2x128xf32, #tpu.memory_space<vmem>>, vector<2x16xf32>
      tpu.vector_store %arg6[%c0_14, %c0_15], %2 {strides = array<i32>} : memref<2x128xf32, #tpu.memory_space<vmem>>, vector<2x16xf32>,
    } else {
    }
    %c0_i32_4 = arith.constant 0 : i32
    %6 = arith.cmpi sgt, %arg1, %c0_i32_4 : i32
    %7 = arith.extui %6 : i1 to i32
    %c0_i32_5 = arith.constant 0 : i32
    %8 = arith.cmpi ne, %7, %c0_i32_5 : i32
    scf.if %8 {
      %c0_8 = arith.constant 0 : index
      %c0_9 = arith.constant 0 : index
      %12 = vector.load %arg5[%c0_8, %c0_9] : memref<2x128xf32, #tpu.memory_space<vmem>>, vector<2x16xf32>
      %13 = arith.addf %12, %1 : vector<2x16xf32>
      %c0_10 = arith.constant 0 : index
      %c0_11 = arith.constant 0 : index
      %14 = vector.load %arg5[%c0_10, %c0_11] : memref<2x128xf32, #tpu.memory_space<vmem>>, vector<2x16xf32>
      tpu.vector_store %arg5[%c0_10, %c0_11], %13 {strides = array<i32>} : memref<2x128xf32, #tpu.memory_space<vmem>>, vector<2x16xf32>,
      %c0_12 = arith.constant 0 : index
      %c0_13 = arith.constant 0 : index
      %15 = vector.load %arg6[%c0_12, %c0_13] : memref<2x128xf32, #tpu.memory_space<vmem>>, vector<2x16xf32>
      %16 = arith.maximumf %15, %2 : vector<2x16xf32>
      %c0_14 = arith.constant 0 : index
      %c0_15 = arith.constant 0 : index
      %17 = vector.load %arg6[%c0_14, %c0_15] : memref<2x128xf32, #tpu.memory_space<vmem>>, vector<2x16xf32>
      tpu.vector_store %arg6[%c0_14, %c0_15], %16 {strides = array<i32>} : memref<2x128xf32, #tpu.memory_space<vmem>>, vector<2x16xf32>,
    } else {
    }
    %c0_i32_6 = arith.constant 0 : i32
    %9 = arith.cmpi eq, %arg1, %c0_i32_6 : i32
    %10 = arith.extui %9 : i1 to i32
    %c0_i32_7 = arith.constant 0 : i32
    %11 = arith.cmpi ne, %10, %c0_i32_7 : i32
    scf.if %11 {
      %c0_8 = arith.constant 0 : index
      %c0_9 = arith.constant 0 : index
      %12 = vector.load %arg5[%c0_8, %c0_9] : memref<2x128xf32, #tpu.memory_space<vmem>>, vector<2x128xf32>
      %c0_10 = arith.constant 0 : index
      %c0_11 = arith.constant 0 : index
      %13 = vector.load %arg6[%c0_10, %c0_11] : memref<2x128xf32, #tpu.memory_space<vmem>>, vector<2x128xf32>
      %cst_12 = arith.constant 0.000000e+00 : f32
      %14 = vector.broadcast %cst_12 : f32 to vector<2x128xf32>
      %c3_i32 = arith.constant 3 : i32
      %15 = tpu.dynamic_rotate %12 by %c3_i32 dim 1 : vector<2x128xf32>, i32 -> vector<2x128xf32>
      %c3_i32_13 = arith.constant 3 : i32
      %16 = tpu.dynamic_rotate %13 by %c3_i32_13 dim 1 : vector<2x128xf32>, i32 -> vector<2x128xf32>
      %c0_14 = arith.constant 0 : index
      %c0_15 = arith.constant 0 : index
      %17 = memref.load %arg3[%c0_14, %c0_15] : memref<2x7xf32, #tpu.memory_space<smem>>
      %18 = vector.broadcast %17 : f32 to vector<2x128xf32>
      %19 = arith.mulf %18, %15 : vector<2x128xf32>
      %20 = arith.addf %14, %19 : vector<2x128xf32>
      %c1 = arith.constant 1 : index
      %c0_16 = arith.constant 0 : index
      %21 = memref.load %arg3[%c1, %c0_16] : memref<2x7xf32, #tpu.memory_space<smem>>
      %22 = vector.broadcast %21 : f32 to vector<2x128xf32>
      %23 = arith.mulf %22, %16 : vector<2x128xf32>
      %24 = arith.addf %20, %23 : vector<2x128xf32>
      %c2_i32 = arith.constant 2 : i32
      %25 = tpu.dynamic_rotate %12 by %c2_i32 dim 1 : vector<2x128xf32>, i32 -> vector<2x128xf32>
      %c2_i32_17 = arith.constant 2 : i32
      %26 = tpu.dynamic_rotate %13 by %c2_i32_17 dim 1 : vector<2x128xf32>, i32 -> vector<2x128xf32>
      %c0_18 = arith.constant 0 : index
      %c1_19 = arith.constant 1 : index
      %27 = memref.load %arg3[%c0_18, %c1_19] : memref<2x7xf32, #tpu.memory_space<smem>>
      %28 = vector.broadcast %27 : f32 to vector<2x128xf32>
      %29 = arith.mulf %28, %25 : vector<2x128xf32>
      %30 = arith.addf %24, %29 : vector<2x128xf32>
      %c1_20 = arith.constant 1 : index
      %c1_21 = arith.constant 1 : index
      %31 = memref.load %arg3[%c1_20, %c1_21] : memref<2x7xf32, #tpu.memory_space<smem>>
      %32 = vector.broadcast %31 : f32 to vector<2x128xf32>
      %33 = arith.mulf %32, %26 : vector<2x128xf32>
      %34 = arith.addf %30, %33 : vector<2x128xf32>
      %c1_i32 = arith.constant 1 : i32
      %35 = tpu.dynamic_rotate %12 by %c1_i32 dim 1 : vector<2x128xf32>, i32 -> vector<2x128xf32>
      %c1_i32_22 = arith.constant 1 : i32
      %36 = tpu.dynamic_rotate %13 by %c1_i32_22 dim 1 : vector<2x128xf32>, i32 -> vector<2x128xf32>
      %c0_23 = arith.constant 0 : index
      %c2 = arith.constant 2 : index
      %37 = memref.load %arg3[%c0_23, %c2] : memref<2x7xf32, #tpu.memory_space<smem>>
      %38 = vector.broadcast %37 : f32 to vector<2x128xf32>
      %39 = arith.mulf %38, %35 : vector<2x128xf32>
      %40 = arith.addf %34, %39 : vector<2x128xf32>
      %c1_24 = arith.constant 1 : index
      %c2_25 = arith.constant 2 : index
      %41 = memref.load %arg3[%c1_24, %c2_25] : memref<2x7xf32, #tpu.memory_space<smem>>
      %42 = vector.broadcast %41 : f32 to vector<2x128xf32>
      %43 = arith.mulf %42, %36 : vector<2x128xf32>
      %44 = arith.addf %40, %43 : vector<2x128xf32>
      %c0_26 = arith.constant 0 : index
      %c3 = arith.constant 3 : index
      %45 = memref.load %arg3[%c0_26, %c3] : memref<2x7xf32, #tpu.memory_space<smem>>
      %46 = vector.broadcast %45 : f32 to vector<2x128xf32>
      %47 = arith.mulf %46, %12 : vector<2x128xf32>
      %48 = arith.addf %44, %47 : vector<2x128xf32>
      %c1_27 = arith.constant 1 : index
      %c3_28 = arith.constant 3 : index
      %49 = memref.load %arg3[%c1_27, %c3_28] : memref<2x7xf32, #tpu.memory_space<smem>>
      %50 = vector.broadcast %49 : f32 to vector<2x128xf32>
      %51 = arith.mulf %50, %13 : vector<2x128xf32>
      %52 = arith.addf %48, %51 : vector<2x128xf32>
      %c127_i32 = arith.constant 127 : i32
      %53 = tpu.dynamic_rotate %12 by %c127_i32 dim 1 : vector<2x128xf32>, i32 -> vector<2x128xf32>
      %c127_i32_29 = arith.constant 127 : i32
      %54 = tpu.dynamic_rotate %13 by %c127_i32_29 dim 1 : vector<2x128xf32>, i32 -> vector<2x128xf32>
      %c0_30 = arith.constant 0 : index
      %c4 = arith.constant 4 : index
      %55 = memref.load %arg3[%c0_30, %c4] : memref<2x7xf32, #tpu.memory_space<smem>>
      %56 = vector.broadcast %55 : f32 to vector<2x128xf32>
      %57 = arith.mulf %56, %53 : vector<2x128xf32>
      %58 = arith.addf %52, %57 : vector<2x128xf32>
      %c1_31 = arith.constant 1 : index
      %c4_32 = arith.constant 4 : index
      %59 = memref.load %arg3[%c1_31, %c4_32] : memref<2x7xf32, #tpu.memory_space<smem>>
      %60 = vector.broadcast %59 : f32 to vector<2x128xf32>
      %61 = arith.mulf %60, %54 : vector<2x128xf32>
      %62 = arith.addf %58, %61 : vector<2x128xf32>
      %c126_i32 = arith.constant 126 : i32
      %63 = tpu.dynamic_rotate %12 by %c126_i32 dim 1 : vector<2x128xf32>, i32 -> vector<2x128xf32>
      %c126_i32_33 = arith.constant 126 : i32
      %64 = tpu.dynamic_rotate %13 by %c126_i32_33 dim 1 : vector<2x128xf32>, i32 -> vector<2x128xf32>
      %c0_34 = arith.constant 0 : index
      %c5 = arith.constant 5 : index
      %65 = memref.load %arg3[%c0_34, %c5] : memref<2x7xf32, #tpu.memory_space<smem>>
      %66 = vector.broadcast %65 : f32 to vector<2x128xf32>
      %67 = arith.mulf %66, %63 : vector<2x128xf32>
      %68 = arith.addf %62, %67 : vector<2x128xf32>
      %c1_35 = arith.constant 1 : index
      %c5_36 = arith.constant 5 : index
      %69 = memref.load %arg3[%c1_35, %c5_36] : memref<2x7xf32, #tpu.memory_space<smem>>
      %70 = vector.broadcast %69 : f32 to vector<2x128xf32>
      %71 = arith.mulf %70, %64 : vector<2x128xf32>
      %72 = arith.addf %68, %71 : vector<2x128xf32>
      %c125_i32 = arith.constant 125 : i32
      %73 = tpu.dynamic_rotate %12 by %c125_i32 dim 1 : vector<2x128xf32>, i32 -> vector<2x128xf32>
      %c125_i32_37 = arith.constant 125 : i32
      %74 = tpu.dynamic_rotate %13 by %c125_i32_37 dim 1 : vector<2x128xf32>, i32 -> vector<2x128xf32>
      %c0_38 = arith.constant 0 : index
      %c6 = arith.constant 6 : index
      %75 = memref.load %arg3[%c0_38, %c6] : memref<2x7xf32, #tpu.memory_space<smem>>
      %76 = vector.broadcast %75 : f32 to vector<2x128xf32>
      %77 = arith.mulf %76, %73 : vector<2x128xf32>
      %78 = arith.addf %72, %77 : vector<2x128xf32>
      %c1_39 = arith.constant 1 : index
      %c6_40 = arith.constant 6 : index
      %79 = memref.load %arg3[%c1_39, %c6_40] : memref<2x7xf32, #tpu.memory_space<smem>>
      %80 = vector.broadcast %79 : f32 to vector<2x128xf32>
      %81 = arith.mulf %80, %74 : vector<2x128xf32>
      %82 = arith.addf %78, %81 : vector<2x128xf32>
      %83 = arith.negf %82 : vector<2x128xf32>
      %84 = math.exp %83 : vector<2x128xf32>
      %cst_41 = arith.constant 1.000000e+00 : f32
      %85 = vector.broadcast %cst_41 : f32 to vector<2x128xf32>
      %86 = arith.addf %85, %84 : vector<2x128xf32>
      %87 = arith.divf %85, %86 : vector<2x128xf32>
      %c0_42 = arith.constant 0 : index
      %c0_43 = arith.constant 0 : index
      %88 = vector.load %arg4[%c0_42, %c0_43] : memref<2x128xf32, #tpu.memory_space<vmem>>, vector<2x128xf32>
      tpu.vector_store %arg4[%c0_42, %c0_43], %87 {strides = array<i32>} : memref<2x128xf32, #tpu.memory_space<vmem>>, vector<2x128xf32>,
    } else {
    }
    return
  }
  func.func @transform_0(%arg0: i32, %arg1: i32) -> (i32, i32, i32) {
    %c0_i32 = arith.constant 0 : i32
    %c0_i32_0 = arith.constant 0 : i32
    return %arg0, %arg1, %c0_i32 : i32, i32, i32
  }
  func.func @transform_1(%arg0: i32, %arg1: i32) -> (i32, i32) {
    %c0_i32 = arith.constant 0 : i32
    %c0_i32_0 = arith.constant 0 : i32
    %c0_i32_1 = arith.constant 0 : i32
    return %c0_i32, %c0_i32_0 : i32, i32
  }
  func.func @transform_2(%arg0: i32, %arg1: i32) -> (i32, i32) {
    %c0_i32 = arith.constant 0 : i32
    %c0_i32_0 = arith.constant 0 : i32
    return %arg0, %c0_i32 : i32, i32
  }
}

</mosaic_0001>

<bundles_post_ra>
// kernel: tpu_custom_call.1
= control target key start
LH: loop header
LB: loop body
LE: loop exit
PB: predicated region body
PF: predicated region fallthrough
CT: control target
= control target key end

     0   :  { %7 = vsyncpa [#allocation5], 0  ;;  %s366_s0 = inlined_call_operand.hbm [shape: f32[2,4,16], index: 0, kind: input, shape index: {}]   ;;  %s367_s1 = inlined_call_operand.hbm [shape: f32[2,7], index: 1, kind: input, shape index: {}]   ;;  %s368_s2 = inlined_call_operand.hbm [shape: f32[2,128], index: 2, kind: output, shape index: {}]  }
   0x1   :  { %8 = vsyncpa [#allocation7], 0 }
   0x2   :  { %9 = vsyncpa [#allocation6], 0  ;;  %s14_s11 = sshll.u32 %s366_s0, 4  ;;  %s330_s12 = smov [#allocation4]   ;;  %s15_s11 = int_to_ptr.hbm [resolvable:$true] %s14_s11 }
   0x3   :  { %s16_s13 = sshll.u32 %s330_s12, 4  ;;  %s28_s16 = sshll.u32 %s367_s1, 4  ;;  %s17_s13 = int_to_ptr.vmem [resolvable:$true] %s16_s13  ;;  %s29_s16 = int_to_ptr.hbm [resolvable:$true] %s28_s16 }
   0x4   :  { %s331_s17 = smov 64   ;;  %s332_s18 = smov 4  }
   0x5   :  { %22 = dma.hbm_to_vmem [thread:$0]  %s15_s11, 128, %s17_s13, [#allocation5], %s331_s17, %s331_s17, %s332_s18  }
   0x6   :  { %s333_s19 = smov [#allocation8]  }
   0x7   :  { %31 = dma.hbm_to_smem %s29_s16, 32, %s333_s19, [#allocation7]  }
   0x8   :  { %324 = dma.done.wait [#allocation5], 128  }
   0x9   :  { %325 = vsyncadd [#allocation5], 4294967168 }
   0xa   :  { %326 = dma.done.wait [#allocation7], 32  }
   0xb   :  { %327 = vsyncadd [#allocation7], 4294967264 }
   0xc   :  { %40 = sfence }
   0xd   :  { %v41_v0 = vld [vmem:[#allocation4] sm:$0xf]  ;;  %v42_v1 = vld [vmem:[#allocation4 + $0x4] sm:$0xf]  ;;  %vm43_vm0 = vcmask 125952   ;;  %vm76_vm1 = vcmask 1041536  }
   0xe   :  { %v44_v2 = vsel %vm43_vm0, %v41_v0, 0.0  ;;  %v51_v3 = vsel %vm43_vm0, %v42_v1, 0.0  ;;  %v334_v6 = vmov 0.0   ;;  %v58_v7 = vsel %vm43_vm0, %v41_v0, -inf  ;;  %s335_s0 = smov 3   ;;  %s336_s1 = smov 2  }
   0xf   :  { %v45_v4 = vrot.slane %v44_v2, 4  ;;  %v52_v5 = vrot.slane %v51_v3, 4  ;;  %77 = vst.msk [vmem:[#allocation2] sm:$0x3] %vm76_vm1, %v334_v6  ;;  %v59_v8 = vrot.slane %v58_v7, 4  ;;  %v65_v9 = vsel %vm43_vm0, %v42_v1, -inf }
  0x10   :  { %78 = vst.msk [vmem:[#allocation3] sm:$0x3] %vm76_vm1, %v334_v6  ;;  %v66_v12 = vrot.slane %v65_v9, 4  ;;  %vm81_vm2 = vcmask 1041409   ;;  %vm84_vm3 = vcmask 123904   ;;  %s337_s20 = smov 1  }
  0x11   :  { %v46_v10 = vadd.f32 %v45_v4, %v44_v2  ;;  %v53_v11 = vadd.f32 %v52_v5, %v51_v3  ;;  %v60_v13 = vmax.f32 %v58_v7, %v59_v8  ;;  %s338_s21 = smov 127   ;;  %s339_s22 = smov 126  }
  0x12   :  { %v67_v16 = vmax.f32 %v65_v9, %v66_v12  ;;  %s340_s23 = smov 125   ;;  %s120_s24 = sld [smem:[#allocation8]] }
  0x13   :  { %v47_v14 = vrot.slane %v46_v10, 2  ;;  %v54_v15 = vrot.slane %v53_v11, 2  ;;  %v61_v17 = vrot.slane %v60_v13, 2  ;;  %s234_s25 = sld [smem:[#allocation8 + $0x80]]  ;;  %s341_s10 = smov [#allocation9]  }
  0x14   :  { %v68_v20 = vrot.slane %v67_v16, 2  ;;  %s235_s26 = sld [smem:[#allocation8 + $0x1]]  ;;  %s221_s11 = sshll.u32 %s341_s10, 4  ;;  %s222_s11 = int_to_ptr.vmem [resolvable:$true] %s221_s11 }
  0x15   :  { %v48_v18 = vadd.f32 %v47_v14, %v46_v10  ;;  %v55_v19 = vadd.f32 %v54_v15, %v53_v11  ;;  %v62_v21 = vmax.f32 %v60_v13, %v61_v17  ;;  %s236_s27 = sld [smem:[#allocation8 + $0x81]]  ;;  %s223_s14 = sshll.u32 %s368_s2, 4  ;;  %s224_s14 = int_to_ptr.hbm [resolvable:$true] %s223_s14 }
  0x16   :  { %v69_v24 = vmax.f32 %v67_v16, %v68_v20  ;;  %s237_s28 = sld [smem:[#allocation8 + $0x2]] }
  0x17   :  { %v49_v22 = vrot.slane %v48_v18, 1  ;;  %v56_v23 = vrot.slane %v55_v19, 1  ;;  %v63_v25 = vrot.slane %v62_v21, 1  ;;  %s238_s29 = sld [smem:[#allocation8 + $0x82]] }
  0x18   :  { %v70_v28 = vrot.slane %v69_v24, 1  ;;  %v121_v38 = vstv %s120_s24  ;;  %s239_s30 = sld [smem:[#allocation8 + $0x3]] }
  0x19   :  { %v50_v26 = vadd.f32 %v49_v22, %v48_v18  ;;  %v57_v27 = vadd.f32 %v56_v23, %v55_v19  ;;  %v64_v29 = vmax.f32 %v62_v21, %v63_v25  ;;  %v125_v39 = vstv %s234_s25  ;;  %s240_s3 = sld [smem:[#allocation8 + $0x83]] }
  0x1a   :  { %v71_v31 = vmax.f32 %v69_v24, %v70_v28  ;;  %v133_v41 = vstv %s235_s26  ;;  %s241_s4 = sld [smem:[#allocation8 + $0x4]] }
  0x1b   :  { %v82_v30 = vsel %vm81_vm2, %v57_v27, %v50_v26  ;;  %v137_v43 = vstv %s236_s27  ;;  %s242_s5 = sld [smem:[#allocation8 + $0x84]] }
  0x1c   :  { %85 = vst.msk [vmem:[#allocation2] sm:$0x3] %vm84_vm3, %v82_v30  ;;  %v88_v32 = vsel %vm81_vm2, %v71_v31, %v64_v29  ;;  %v145_v50 = vstv %s237_s28  ;;  %s243_s6 = sld [smem:[#allocation8 + $0x5]] }
  0x1d   :  { %90 = vst.msk [vmem:[#allocation3] sm:$0x3] %vm84_vm3, %v88_v32  ;;  %v149_v51 = vstv %s238_s29  ;;  %s244_s7 = sld [smem:[#allocation8 + $0x85]] }
  0x1e   :  { %v153_v53 = vstv %s239_s30  ;;  %s245_s8 = sld [smem:[#allocation8 + $0x6]] }
  0x1f   :  { %v157_v57 = vstv %s240_s3  ;;  %s246_s9 = sld [smem:[#allocation8 + $0x86]] }
  0x20   :  { %v165_v1 = vstv %s241_s4 }
  0x21   :  { %v169_v3 = vstv %s242_s5 }
  0x22   :  { %v177_v6 = vstv %s243_s6 }
  0x23   :  { %v114_v33 = vld [vmem:[#allocation2] sm:$0x3]  ;;  %v181_v7 = vstv %s244_s7 }
  0x24   :  { %116 = vrot.lane.b32.xlu0 %v114_v33, %s335_s0  ;;  %128 = vrot.lane.b32.xlu1 %v114_v33, %s336_s1  ;;  %v115_v34 = vld [vmem:[#allocation3] sm:$0x3]  ;;  %v154_v61 = vmul.f32 %v153_v53, %v114_v33  ;;  %v189_v11 = vstv %s245_s8 }
  0x25   :  { %140 = vrot.lane.b32.xlu2 %v114_v33, %s337_s20  ;;  %v158_v0 = vmul.f32 %v157_v57, %v115_v34  ;;  %v193_v16 = vstv %s246_s9 }
  0x2c   :  { %118 = vrot.lane.b32.xlu0 %v115_v34, %s335_s0  ;;  %130 = vrot.lane.b32.xlu1 %v115_v34, %s336_s1 }
  0x2d   :  { %142 = vrot.lane.b32.xlu2 %v115_v34, %s337_s20 }
  0x34   :  { %160 = vrot.lane.b32.xlu0 %v114_v33, %s338_s21  ;;  %162 = vrot.lane.b32.xlu1 %v115_v34, %s338_s21 }
  0x35   :  { %172 = vrot.lane.b32.xlu2 %v114_v33, %s339_s22 }
  0x3c   :  { %174 = vrot.lane.b32.xlu0 %v115_v34, %s339_s22  ;;  %184 = vrot.lane.b32.xlu1 %v114_v33, %s340_s23 }
  0x3d   :  { %186 = vrot.lane.b32.xlu2 %v115_v34, %s340_s23 }
  0x7f   :  { %v141_v35 = vpop.permute.xlu2 %140 }
  0x80   :  { %v146_v54 = vmul.f32 %v145_v50, %v141_v35 }
  0x87   :  { %v143_v40 = vpop.permute.xlu2 %142 }
  0x88   :  { %v150_v56 = vmul.f32 %v149_v51, %v143_v40 }
  0x8f   :  { %v173_v62 = vpop.permute.xlu2 %172 }
  0x90   :  { %v178_v14 = vmul.f32 %v177_v6, %v173_v62 }
  0x96   :  { %v117_v36 = vpop.permute.xlu0 %116  ;;  %v129_v37 = vpop.permute.xlu1 %128 }
  0x97   :  { %v122_v45 = vmul.f32 %v121_v38, %v117_v36  ;;  %v134_v47 = vmul.f32 %v133_v41, %v129_v37  ;;  %v187_v17 = vpop.permute.xlu2 %186 }
  0x98   :  { %v194_v21 = vmul.f32 %v193_v16, %v187_v17 }
  0x9e   :  { %v119_v42 = vpop.permute.xlu0 %118  ;;  %v131_v44 = vpop.permute.xlu1 %130 }
  0x9f   :  { %v126_v46 = vmul.f32 %v125_v39, %v119_v42  ;;  %v138_v49 = vmul.f32 %v137_v43, %v131_v44 }
  0xa1   :  { %v127_v48 = vadd.f32 %v126_v46, %v122_v45 }
  0xa3   :  { %v135_v52 = vadd.f32 %v134_v47, %v127_v48 }
  0xa5   :  { %v139_v55 = vadd.f32 %v138_v49, %v135_v52 }
  0xa6   :  { %v161_v58 = vpop.permute.xlu0 %160  ;;  %v163_v59 = vpop.permute.xlu1 %162 }
  0xa7   :  { %v147_v60 = vadd.f32 %v146_v54, %v139_v55  ;;  %v166_v5 = vmul.f32 %v165_v1, %v161_v58  ;;  %v170_v10 = vmul.f32 %v169_v3, %v163_v59 }
  0xa9   :  { %v151_v63 = vadd.f32 %v150_v56, %v147_v60 }
  0xab   :  { %v155_v2 = vadd.f32 %v154_v61, %v151_v63 }
  0xad   :  { %v159_v4 = vadd.f32 %v158_v0, %v155_v2 }
  0xae   :  { %v175_v8 = vpop.permute.xlu0 %174  ;;  %v185_v12 = vpop.permute.xlu1 %184 }
  0xaf   :  { %v167_v9 = vadd.f32 %v166_v5, %v159_v4  ;;  %v182_v15 = vmul.f32 %v181_v7, %v175_v8  ;;  %v190_v19 = vmul.f32 %v189_v11, %v185_v12 }
  0xb1   :  { %v171_v13 = vadd.f32 %v170_v10, %v167_v9 }
  0xb3   :  { %v179_v18 = vadd.f32 %v178_v14, %v171_v13 }
  0xb5   :  { %v183_v20 = vadd.f32 %v182_v15, %v179_v18 }
  0xb7   :  { %v191_v22 = vadd.f32 %v190_v19, %v183_v20 }
  0xb9   :  { %v195_v23 = vadd.f32 %v194_v21, %v191_v22 }
  0xbb   :  { %v247_v24 = vmul.f32 -1.442695, %v195_v23 }
  0xbd   :  { %260 = vpow2.f32 %v247_v24 }
  0xc3   :  { %v261_v25 = vpop.eup %260 }
  0xc4   :  { %v199_v26 = vadd.f32 1.0, %v261_v25 }
  0xc6   :  { %262 = vrcp.f32 %v199_v26  ;;  %v211_v30 = vand.u32 2147483648, %v199_v26  ;;  %v209_v32 = vand.u32 2147483647, %v199_v26  ;;  %vm205_vm5 = vweird.f32 %v199_v26 }
  0xc8   :  { %v212_v34 = vor.u32 1.1754944e-38, %v211_v30  ;;  %vm210_vm7 = vcmp.eq.f32.partialorder %v209_v32, 8.507059e+37 }
  0xcc   :  { %v263_v27 = vpop.eup %262 }
  0xcd   :  { %v201_v28 = vmul.f32 %v263_v27, %v199_v26  ;;  %vm206_vm4 = vweird.f32 %v263_v27 }
  0xce   :  { %vm207_vm6 = vmor %vm205_vm5, %vm206_vm4 }
  0xcf   :  { %v202_v29 = vsub.f32 1.0, %v201_v28 }
  0xd1   :  { %v203_v31 = vmul.f32 %v263_v27, %v202_v29 }
  0xd3   :  { %v204_v33 = vadd.f32 %v263_v27, %v203_v31 }
  0xd5   :  { %v208_v35 = vsel %vm207_vm6, %v263_v27, %v204_v33 }
  0xd6   :  { %v213_v36 = vsel %vm210_vm7, %v212_v34, %v208_v35 }
  0xd7   :  { %215 = vst [vmem:[#allocation9] sm:$0x3] %v213_v36 }
  0xd8   :  { %226 = dma.vmem_to_hbm [thread:$0]  %s222_s11, 32, %s224_s14, [#allocation6]  }
  0xd9   :  { %328 = dma.done.wait [#allocation6], 32  }
  0xda   :  { %329 = vsyncadd [#allocation6], 4294967264 }
  0xdb   :  { %231 = vsyncpa [#allocation5], 1 }
  0xdc   :  { %232 = vsyncpa [#allocation6], 1 }
  0xdd   :  { %233 = vsyncpa [#allocation7], 1 }

</bundles_post_ra>
